<compile_context>
chip_gen: v6e
topology: v6e:2x2x1
jax: 0.10.0
libtpu: 0.0.40
codegen_flags: <defaults>
</compile_context>

<pallas_src>
import math
import functools

import jax
import jax.numpy as jnp
from jax import lax
from jax.experimental import pallas as pl
from jax.experimental.pallas import tpu as pltpu


# ----------------------------------------------------------------------------
# VMEM limit: ~3/4 of physical (96 MiB on v5e/v6e, 48 MiB on v7x).
# ----------------------------------------------------------------------------
def _vmem_limit_bytes():
    try:
        cap = pltpu.get_tpu_info().vmem_capacity_bytes
    except Exception:
        cap = 64 * 1024 * 1024          # conservative (v7x-sized) fallback
    return min(96 * 1024 * 1024, (3 * cap) // 4)


# ----------------------------------------------------------------------------
# Shared attention core: per-head scaled-dot-product attention with the output
# projection folded into the head loop (accumulated in f32).
#   q_bf/k_bf/v_bf : [S, D] bf16 (q already carries the 1/sqrt(d_k) scale)
#   bias           : [S, S] f32 additive mask bias (0 / -1e9)
#   wo_bf          : [D, D] bf16,  bo: [1, D] f32
# ----------------------------------------------------------------------------
def _attention_core(q_bf, k_bf, v_bf, bias, wo_bf, bo, o_ref, *, h, d_k):
    out_acc = None
    for hh in range(h):                              # static unroll over heads
        lo = hh * d_k
        q_h = q_bf[:, lo:lo + d_k]                   # [S, d_k] bf16
        k_h = k_bf[:, lo:lo + d_k]
        v_h = v_bf[:, lo:lo + d_k]

        # 'qd,kd->qk': contract last dims of both operands — no k.T needed.
        s = lax.dot_general(q_h, k_h, (((1,), (1,)), ((), ())),
                            preferred_element_type=jnp.float32)   # [S, S] f32
        s = s + bias

        # Numerically-stable softmax statistics in f32.
        m = jnp.max(s, axis=-1, keepdims=True)
        e = jnp.exp(s - m)                                        # [S, S] f32
        l = jnp.sum(e, axis=-1, keepdims=True)                    # [S, 1]

        # Deferred normalization: (e @ v) * 1/l  (S*d_k mults, not S*S).
        acc = jnp.dot(e.astype(jnp.bfloat16), v_h,
                      preferred_element_type=jnp.float32)         # [S, d_k]
        out_h = acc * pl.reciprocal(l, approx=True)               # EUP recip

        # Fold W_o into the head loop: row slice of wo is sublane-aligned,
        # no concat scratch, no masked lane stores.
        contrib = jnp.dot(out_h.astype(jnp.bfloat16), wo_bf[lo:lo + d_k, :],
                          preferred_element_type=jnp.float32)     # [S, D]
        out_acc = contrib if out_acc is None else out_acc + contrib

    o_ref[0] = (out_acc + bo).astype(o_ref.dtype)


# ----------------------------------------------------------------------------
# Kernel bodies (one grid step == one batch element, resident in VMEM).
# ----------------------------------------------------------------------------
def _mha_self_kernel(x_ref, wqkv_ref, bqkv_ref, wo_ref, bo_ref, bias_ref,
                     o_ref, *, h, d_k):
    D = h * d_k
    x_bf = x_ref[0].astype(jnp.bfloat16)                          # [S, D]
    # Single fused QKV matmul against the packed [D, 3D] slab.
    qkv = jnp.dot(x_bf, wqkv_ref[...],
                  preferred_element_type=jnp.float32) + bqkv_ref[...]
    qkv_bf = qkv.astype(jnp.bfloat16)                             # [S, 3D]
    bias = bias_ref[0].astype(jnp.float32)                        # [S, S]
    _attention_core(qkv_bf[:, 0 * D:1 * D], qkv_bf[:, 1 * D:2 * D],
                    qkv_bf[:, 2 * D:3 * D], bias, wo_ref[...], bo_ref[...],
                    o_ref, h=h, d_k=d_k)


def _mha_cross_kernel(q_ref, k_ref, v_ref, wqkv_ref, bqkv_ref, wo_ref, bo_ref,
                      bias_ref, o_ref, *, h, d_k):
    D = h * d_k
    wqkv = wqkv_ref[...]                                          # [D, 3D] bf16
    bqkv = bqkv_ref[...]                                          # [1, 3D] f32
    q2 = jnp.dot(q_ref[0].astype(jnp.bfloat16), wqkv[:, 0 * D:1 * D],
                 preferred_element_type=jnp.float32) + bqkv[:, 0 * D:1 * D]
    k2 = jnp.dot(k_ref[0].astype(jnp.bfloat16), wqkv[:, 1 * D:2 * D],
                 preferred_element_type=jnp.float32) + bqkv[:, 1 * D:2 * D]
    v2 = jnp.dot(v_ref[0].astype(jnp.bfloat16), wqkv[:, 2 * D:3 * D],
                 preferred_element_type=jnp.float32) + bqkv[:, 2 * D:3 * D]
    bias = bias_ref[0].astype(jnp.float32)
    _attention_core(q2.astype(jnp.bfloat16), k2.astype(jnp.bfloat16),
                    v2.astype(jnp.bfloat16), bias, wo_ref[...], bo_ref[...],
                    o_ref, h=h, d_k=d_k)


# ----------------------------------------------------------------------------
# Parameter packing (one-time, host side):
#   wq|wk|wv -> [D, 3D] bf16 (q columns pre-scaled by 1/sqrt(d_k)),
#   biases   -> 2-D f32 rows, wo -> bf16, bo -> [1, D] f32.
# ----------------------------------------------------------------------------
def pack_params(h, wq, bq, wk, bk, wv, bv, wo, bo):
    d_model = wq.shape[0]
    scale = jnp.float32(1.0 / math.sqrt(d_model // h))
    return {
        "h": h,
        "wqkv": jnp.concatenate([wq * scale, wk, wv], axis=1).astype(jnp.bfloat16),
        "bqkv": jnp.concatenate([bq * scale, bk, bv]).reshape(1, 3 * d_model)
                  .astype(jnp.float32),
        "wo": wo.astype(jnp.bfloat16),
        "bo": bo.reshape(1, d_model).astype(jnp.float32),
    }


# ----------------------------------------------------------------------------
# Forward wrapper
# ----------------------------------------------------------------------------
def multi_headed_attention(params, query, key, value, mask=None):
    """query/key/value: [B, S, d_model]; mask: [1, S, S] / [B, S, S] / None."""
    B, S, D = query.shape
    h = params["h"]
    d_k = D // h
    self_attn = (query is key) and (key is value)

    # Additive bias precomputed outside: one add per score element instead of
    # compare+select; shipped bf16 to halve the per-step [S,S] DMA.
    if mask is None:
        bias = jnp.zeros((1, S, S), jnp.bfloat16)
    else:
        m = mask.reshape((-1, S, S))
        bias = jnp.where(m == 0, jnp.float32(-1e9),
                         jnp.float32(0.0)).astype(jnp.bfloat16)
    Bm = bias.shape[0]
    if Bm == 1:
        bias_map = lambda b: (0, 0, 0)
    else:
        assert Bm == B, "mask batch dim must be 1 or B"
        bias_map = lambda b: (b, 0, 0)

    row_spec = pl.BlockSpec((1, S, D), lambda b: (b, 0, 0))
    weight_specs = [
        pl.BlockSpec((D, 3 * D), lambda b: (0, 0)),   # wqkv (constant block)
        pl.BlockSpec((1, 3 * D), lambda b: (0, 0)),   # bqkv
        pl.BlockSpec((D, D), lambda b: (0, 0)),       # wo
        pl.BlockSpec((1, D), lambda b: (0, 0)),       # bo
        pl.BlockSpec((1, S, S), bias_map),            # additive mask bias
    ]

    if self_attn:
        kern = functools.partial(_mha_self_kernel, h=h, d_k=d_k)
        in_specs = [row_spec] + weight_specs
        inputs = (query, params["wqkv"], params["bqkv"],
                  params["wo"], params["bo"], bias)
    else:
        kern = functools.partial(_mha_cross_kernel, h=h, d_k=d_k)
        in_specs = [row_spec, row_spec, row_spec] + weight_specs
        inputs = (query, key, value, params["wqkv"], params["bqkv"],
                  params["wo"], params["bo"], bias)

    # Advisory cost estimate for XLA scheduling around the custom call.
    flops = (2 * B * S * D * 3 * D            # QKV projection(s)
             + 2 * B * h * S * S * d_k * 2    # QK^T and E@V
             + 2 * B * S * D * D)             # output projection (per-head acc)
    bytes_accessed = sum(int(a.size) * a.dtype.itemsize for a in inputs)
    bytes_accessed += int(B * S * D) * query.dtype.itemsize
    cost = pl.CostEstimate(flops=int(flops),
                           transcendentals=int(B * h * S * S),
                           bytes_accessed=int(bytes_accessed))

    return pl.pallas_call(
        kern,
        out_shape=jax.ShapeDtypeStruct((B, S, D), query.dtype),
        grid=(B,),
        in_specs=in_specs,
        out_specs=pl.BlockSpec((1, S, D), lambda b: (b, 0, 0)),
        compiler_params=pltpu.CompilerParams(
            dimension_semantics=("parallel",),        # shard batch over TCs
            vmem_limit_bytes=_vmem_limit_bytes()),
        cost_estimate=cost,
    )(*inputs)


# ----------------------------------------------------------------------------
# Pure-JAX reference (unpacked f32 weights) for correctness checking
# ----------------------------------------------------------------------------
def _reference(raw, query, key, value, mask):
    B, S, d_model = query.shape
    h, d_k = raw["h"], d_model // raw["h"]

    def proj(x, w, b):
        y = x @ w + b
        return y.reshape(B, S, h, d_k).transpose(0, 2, 1, 3)

    q = proj(query, raw["wq"], raw["bq"])
    k = proj(key, raw["wk"], raw["bk"])
    v = proj(value, raw["wv"], raw["bv"])
    scores = jnp.einsum("bhqd,bhkd->bhqk", q, k) / math.sqrt(d_k)
    if mask is not None:
        scores = jnp.where(mask.reshape(1, 1, S, S) == 0, -1e9, scores)
    p = jax.nn.softmax(scores, axis=-1)
    x = jnp.einsum("bhqk,bhkd->bhqd", p, v)
    x = x.transpose(0, 2, 1, 3).reshape(B, S, d_model)
    return x @ raw["wo"] + raw["bo"]


if __name__ == "__main__":
    B, S, d_model, h = 2, 8, 32, 4

    key0 = jax.random.PRNGKey(0)
    ks = jax.random.split(key0, 12)
    init = lambda k, shape: (jax.random.normal(k, shape, jnp.float32)
                             * (1.0 / math.sqrt(shape[0])))
    raw = {
        "h": h,
        "wq": init(ks[0], (d_model, d_model)), "bq": jax.random.normal(ks[1], (d_model,)) * 0.01,
        "wk": init(ks[2], (d_model, d_model)), "bk": jax.random.normal(ks[3], (d_model,)) * 0.01,
        "wv": init(ks[4], (d_model, d_model)), "bv": jax.random.normal(ks[5], (d_model,)) * 0.01,
        "wo": init(ks[6], (d_model, d_model)), "bo": jax.random.normal(ks[7], (d_model,)) * 0.01,
    }
    params = pack_params(h, raw["wq"], raw["bq"], raw["wk"], raw["bk"],
                         raw["wv"], raw["bv"], raw["wo"], raw["bo"])

    query = jax.random.normal(ks[8], (B, S, d_model), jnp.float32)
    keyx = jax.random.normal(ks[9], (B, S, d_model), jnp.float32)
    value = jax.random.normal(ks[10], (B, S, d_model), jnp.float32)
    # causal-style mask, [1, S, S] as the PyTorch module expects
    mask = jnp.tril(jnp.ones((S, S), jnp.float32)).reshape(1, S, S)

    # Tolerances reflect the bf16 MXU operands (f32 accumulation) and the
    # EUP approximate reciprocal in the softmax denominator.
    ATOL = RTOL = 5e-2

    # General (cross-attention) path: distinct q/k/v.
    out = multi_headed_attention(params, query, keyx, value, mask)
    out = jax.block_until_ready(out)
    ref = _reference(raw, query, keyx, value, mask)
    assert out.shape == (B, S, d_model)
    assert jnp.allclose(out, ref, atol=ATOL, rtol=RTOL), "cross-attn mismatch"

    # Self-attention fast path: single input, one fused [S,D]@[D,3D] matmul.
    out_s = multi_headed_attention(params, query, query, query, mask)
    out_s = jax.block_until_ready(out_s)
    ref_s = _reference(raw, query, query, query, mask)
    assert jnp.allclose(out_s, ref_s, atol=ATOL, rtol=RTOL), "self-attn mismatch"

    print("KERNEL_OK")
</pallas_src>

<mosaic_0001>
module attributes {stable_mosaic.version = 11 : i64} {
  func.func @_mha_cross_kernel(%arg0: i32, %arg1: memref<1x8x32xf32, #tpu.memory_space<vmem>>, %arg2: memref<1x8x32xf32, #tpu.memory_space<vmem>>, %arg3: memref<1x8x32xf32, #tpu.memory_space<vmem>>, %arg4: memref<32x96xbf16, #tpu.memory_space<vmem>>, %arg5: memref<1x96xf32, #tpu.memory_space<vmem>>, %arg6: memref<32x32xbf16, #tpu.memory_space<vmem>>, %arg7: memref<1x32xf32, #tpu.memory_space<vmem>>, %arg8: memref<1x8x8xbf16, #tpu.memory_space<vmem>>, %arg9: memref<1x8x32xf32, #tpu.memory_space<vmem>>) attributes {dimension_semantics = [#tpu.dimension_semantics<parallel>], iteration_bounds = array<i64: 2>, scalar_prefetch = 0 : i64, scratch_operands = 0 : i64, tpu.core_type = #tpu.core_type<tc>, window_params = [{transform_indices = @transform_0, window_bounds = array<i64: 1, 8, 32>}, {transform_indices = @transform_1, window_bounds = array<i64: 1, 8, 32>}, {transform_indices = @transform_2, window_bounds = array<i64: 1, 8, 32>}, {pipeline_mode = #tpu.pipeline_mode<synchronous>, transform_indices = @transform_3, window_bounds = array<i64: 32, 96>}, {pipeline_mode = #tpu.pipeline_mode<synchronous>, transform_indices = @transform_4, window_bounds = array<i64: 1, 96>}, {pipeline_mode = #tpu.pipeline_mode<synchronous>, transform_indices = @transform_5, window_bounds = array<i64: 32, 32>}, {pipeline_mode = #tpu.pipeline_mode<synchronous>, transform_indices = @transform_6, window_bounds = array<i64: 1, 32>}, {pipeline_mode = #tpu.pipeline_mode<synchronous>, transform_indices = @transform_7, window_bounds = array<i64: 1, 8, 8>}, {transform_indices = @transform_8, window_bounds = array<i64: 1, 8, 32>}]} {
    %c0 = arith.constant 0 : index
    %c0_0 = arith.constant 0 : index
    %0 = vector.load %arg4[%c0, %c0_0] : memref<32x96xbf16, #tpu.memory_space<vmem>>, vector<32x96xbf16>
    %c0_1 = arith.constant 0 : index
    %c0_2 = arith.constant 0 : index
    %1 = vector.load %arg5[%c0_1, %c0_2] : memref<1x96xf32, #tpu.memory_space<vmem>>, vector<1x96xf32>
    %c0_3 = arith.constant 0 : index
    %c0_4 = arith.constant 0 : index
    %c0_5 = arith.constant 0 : index
    %2 = vector.load %arg1[%c0_3, %c0_4, %c0_5] : memref<1x8x32xf32, #tpu.memory_space<vmem>>, vector<1x8x32xf32>
    %3 = vector.shape_cast %2 : vector<1x8x32xf32> to vector<8x32xf32>
    %4 = arith.truncf %3 : vector<8x32xf32> to vector<8x32xbf16>
    %5 = vector.extract_strided_slice %0 {offsets = [0, 0], sizes = [32, 32], strides = [1, 1]} : vector<32x96xbf16> to vector<32x32xbf16>
    %cst = arith.constant dense<0.000000e+00> : vector<8x32xf32>
    %6 = tpu.matmul %4, %5, %cst {dimension_numbers = #tpu.dot_dimension_numbers<[1], [0], [0], [1], [0, 0, 1, 1], [], []>} : vector<8x32xbf16>, vector<32x32xbf16>, vector<8x32xf32> -> vector<8x32xf32>
    %7 = vector.extract_strided_slice %1 {offsets = [0, 0], sizes = [1, 32], strides = [1, 1]} : vector<1x96xf32> to vector<1x32xf32>
    %8 = vector.broadcast %7 : vector<1x32xf32> to vector<8x32xf32>
    %9 = arith.addf %6, %8 : vector<8x32xf32>
    %c0_6 = arith.constant 0 : index
    %c0_7 = arith.constant 0 : index
    %c0_8 = arith.constant 0 : index
    %10 = vector.load %arg2[%c0_6, %c0_7, %c0_8] : memref<1x8x32xf32, #tpu.memory_space<vmem>>, vector<1x8x32xf32>
    %11 = vector.shape_cast %10 : vector<1x8x32xf32> to vector<8x32xf32>
    %12 = arith.truncf %11 : vector<8x32xf32> to vector<8x32xbf16>
    %13 = vector.extract_strided_slice %0 {offsets = [0, 32], sizes = [32, 32], strides = [1, 1]} : vector<32x96xbf16> to vector<32x32xbf16>
    %cst_9 = arith.constant dense<0.000000e+00> : vector<8x32xf32>
    %14 = tpu.matmul %12, %13, %cst_9 {dimension_numbers = #tpu.dot_dimension_numbers<[1], [0], [0], [1], [0, 0, 1, 1], [], []>} : vector<8x32xbf16>, vector<32x32xbf16>, vector<8x32xf32> -> vector<8x32xf32>
    %15 = vector.extract_strided_slice %1 {offsets = [0, 32], sizes = [1, 32], strides = [1, 1]} : vector<1x96xf32> to vector<1x32xf32>
    %16 = vector.broadcast %15 : vector<1x32xf32> to vector<8x32xf32>
    %17 = arith.addf %14, %16 : vector<8x32xf32>
    %c0_10 = arith.constant 0 : index
    %c0_11 = arith.constant 0 : index
    %c0_12 = arith.constant 0 : index
    %18 = vector.load %arg3[%c0_10, %c0_11, %c0_12] : memref<1x8x32xf32, #tpu.memory_space<vmem>>, vector<1x8x32xf32>
    %19 = vector.shape_cast %18 : vector<1x8x32xf32> to vector<8x32xf32>
    %20 = arith.truncf %19 : vector<8x32xf32> to vector<8x32xbf16>
    %21 = vector.extract_strided_slice %0 {offsets = [0, 64], sizes = [32, 32], strides = [1, 1]} : vector<32x96xbf16> to vector<32x32xbf16>
    %cst_13 = arith.constant dense<0.000000e+00> : vector<8x32xf32>
    %22 = tpu.matmul %20, %21, %cst_13 {dimension_numbers = #tpu.dot_dimension_numbers<[1], [0], [0], [1], [0, 0, 1, 1], [], []>} : vector<8x32xbf16>, vector<32x32xbf16>, vector<8x32xf32> -> vector<8x32xf32>
    %23 = vector.extract_strided_slice %1 {offsets = [0, 64], sizes = [1, 32], strides = [1, 1]} : vector<1x96xf32> to vector<1x32xf32>
    %24 = vector.broadcast %23 : vector<1x32xf32> to vector<8x32xf32>
    %25 = arith.addf %22, %24 : vector<8x32xf32>
    %c0_14 = arith.constant 0 : index
    %c0_15 = arith.constant 0 : index
    %c0_16 = arith.constant 0 : index
    %26 = vector.load %arg8[%c0_14, %c0_15, %c0_16] : memref<1x8x8xbf16, #tpu.memory_space<vmem>>, vector<1x8x8xbf16>
    %27 = vector.shape_cast %26 : vector<1x8x8xbf16> to vector<8x8xbf16>
    %28 = arith.extf %27 : vector<8x8xbf16> to vector<8x8xf32>
    %29 = arith.truncf %9 : vector<8x32xf32> to vector<8x32xbf16>
    %30 = arith.truncf %17 : vector<8x32xf32> to vector<8x32xbf16>
    %31 = arith.truncf %25 : vector<8x32xf32> to vector<8x32xbf16>
    %c0_17 = arith.constant 0 : index
    %c0_18 = arith.constant 0 : index
    %32 = vector.load %arg6[%c0_17, %c0_18] : memref<32x32xbf16, #tpu.memory_space<vmem>>, vector<32x32xbf16>
    %c0_19 = arith.constant 0 : index
    %c0_20 = arith.constant 0 : index
    %33 = vector.load %arg7[%c0_19, %c0_20] : memref<1x32xf32, #tpu.memory_space<vmem>>, vector<1x32xf32>
    %34 = vector.extract_strided_slice %29 {offsets = [0, 0], sizes = [8, 8], strides = [1, 1]} : vector<8x32xbf16> to vector<8x8xbf16>
    %35 = vector.extract_strided_slice %30 {offsets = [0, 0], sizes = [8, 8], strides = [1, 1]} : vector<8x32xbf16> to vector<8x8xbf16>
    %36 = vector.extract_strided_slice %31 {offsets = [0, 0], sizes = [8, 8], strides = [1, 1]} : vector<8x32xbf16> to vector<8x8xbf16>
    %cst_21 = arith.constant dense<0.000000e+00> : vector<8x8xf32>
    %37 = tpu.matmul %34, %35, %cst_21 {dimension_numbers = #tpu.dot_dimension_numbers<[1], [1], [0], [0], [0, 0, 1, 0], [], []>} : vector<8x8xbf16>, vector<8x8xbf16>, vector<8x8xf32> -> vector<8x8xf32>
    %38 = arith.addf %37, %28 : vector<8x8xf32>
    %cst_22 = arith.constant dense<0xFF800000> : vector<8xf32>
    %39 = vector.multi_reduction <maximumf>, %38, %cst_22 [1] : vector<8x8xf32> to vector<8xf32>
    %40 = vector.shape_cast %39 : vector<8xf32> to vector<8x1xf32>
    %41 = vector.broadcast %40 : vector<8x1xf32> to vector<8x8xf32>
    %42 = arith.subf %38, %41 : vector<8x8xf32>
    %43 = math.exp %42 : vector<8x8xf32>
    %cst_23 = arith.constant dense<0.000000e+00> : vector<8xf32>
    %44 = vector.multi_reduction <add>, %43, %cst_23 [1] : vector<8x8xf32> to vector<8xf32>
    %45 = vector.shape_cast %44 : vector<8xf32> to vector<8x1xf32>
    %46 = arith.truncf %43 : vector<8x8xf32> to vector<8x8xbf16>
    %cst_24 = arith.constant dense<0.000000e+00> : vector<8x8xf32>
    %47 = tpu.matmul %46, %36, %cst_24 {dimension_numbers = #tpu.dot_dimension_numbers<[1], [0], [0], [1], [0, 0, 1, 1], [], []>} : vector<8x8xbf16>, vector<8x8xbf16>, vector<8x8xf32> -> vector<8x8xf32>
    %48 = tpu.reciprocal %45 {approx = true} : vector<8x1xf32> -> vector<8x1xf32>
    %49 = vector.broadcast %48 : vector<8x1xf32> to vector<8x8xf32>
    %50 = arith.mulf %47, %49 : vector<8x8xf32>
    %51 = arith.truncf %50 : vector<8x8xf32> to vector<8x8xbf16>
    %52 = vector.extract_strided_slice %32 {offsets = [0, 0], sizes = [8, 32], strides = [1, 1]} : vector<32x32xbf16> to vector<8x32xbf16>
    %cst_25 = arith.constant dense<0.000000e+00> : vector<8x32xf32>
    %53 = tpu.matmul %51, %52, %cst_25 {dimension_numbers = #tpu.dot_dimension_numbers<[1], [0], [0], [1], [0, 0, 1, 1], [], []>} : vector<8x8xbf16>, vector<8x32xbf16>, vector<8x32xf32> -> vector<8x32xf32>
    %54 = vector.extract_strided_slice %29 {offsets = [0, 8], sizes = [8, 8], strides = [1, 1]} : vector<8x32xbf16> to vector<8x8xbf16>
    %55 = vector.extract_strided_slice %30 {offsets = [0, 8], sizes = [8, 8], strides = [1, 1]} : vector<8x32xbf16> to vector<8x8xbf16>
    %56 = vector.extract_strided_slice %31 {offsets = [0, 8], sizes = [8, 8], strides = [1, 1]} : vector<8x32xbf16> to vector<8x8xbf16>
    %cst_26 = arith.constant dense<0.000000e+00> : vector<8x8xf32>
    %57 = tpu.matmul %54, %55, %cst_26 {dimension_numbers = #tpu.dot_dimension_numbers<[1], [1], [0], [0], [0, 0, 1, 0], [], []>} : vector<8x8xbf16>, vector<8x8xbf16>, vector<8x8xf32> -> vector<8x8xf32>
    %58 = arith.addf %57, %28 : vector<8x8xf32>
    %cst_27 = arith.constant dense<0xFF800000> : vector<8xf32>
    %59 = vector.multi_reduction <maximumf>, %58, %cst_27 [1] : vector<8x8xf32> to vector<8xf32>
    %60 = vector.shape_cast %59 : vector<8xf32> to vector<8x1xf32>
    %61 = vector.broadcast %60 : vector<8x1xf32> to vector<8x8xf32>
    %62 = arith.subf %58, %61 : vector<8x8xf32>
    %63 = math.exp %62 : vector<8x8xf32>
    %cst_28 = arith.constant dense<0.000000e+00> : vector<8xf32>
    %64 = vector.multi_reduction <add>, %63, %cst_28 [1] : vector<8x8xf32> to vector<8xf32>
    %65 = vector.shape_cast %64 : vector<8xf32> to vector<8x1xf32>
    %66 = arith.truncf %63 : vector<8x8xf32> to vector<8x8xbf16>
    %cst_29 = arith.constant dense<0.000000e+00> : vector<8x8xf32>
    %67 = tpu.matmul %66, %56, %cst_29 {dimension_numbers = #tpu.dot_dimension_numbers<[1], [0], [0], [1], [0, 0, 1, 1], [], []>} : vector<8x8xbf16>, vector<8x8xbf16>, vector<8x8xf32> -> vector<8x8xf32>
    %68 = tpu.reciprocal %65 {approx = true} : vector<8x1xf32> -> vector<8x1xf32>
    %69 = vector.broadcast %68 : vector<8x1xf32> to vector<8x8xf32>
    %70 = arith.mulf %67, %69 : vector<8x8xf32>
    %71 = arith.truncf %70 : vector<8x8xf32> to vector<8x8xbf16>
    %72 = vector.extract_strided_slice %32 {offsets = [8, 0], sizes = [8, 32], strides = [1, 1]} : vector<32x32xbf16> to vector<8x32xbf16>
    %cst_30 = arith.constant dense<0.000000e+00> : vector<8x32xf32>
    %73 = tpu.matmul %71, %72, %cst_30 {dimension_numbers = #tpu.dot_dimension_numbers<[1], [0], [0], [1], [0, 0, 1, 1], [], []>} : vector<8x8xbf16>, vector<8x32xbf16>, vector<8x32xf32> -> vector<8x32xf32>
    %74 = arith.addf %53, %73 : vector<8x32xf32>
    %75 = vector.extract_strided_slice %29 {offsets = [0, 16], sizes = [8, 8], strides = [1, 1]} : vector<8x32xbf16> to vector<8x8xbf16>
    %76 = vector.extract_strided_slice %30 {offsets = [0, 16], sizes = [8, 8], strides = [1, 1]} : vector<8x32xbf16> to vector<8x8xbf16>
    %77 = vector.extract_strided_slice %31 {offsets = [0, 16], sizes = [8, 8], strides = [1, 1]} : vector<8x32xbf16> to vector<8x8xbf16>
    %cst_31 = arith.constant dense<0.000000e+00> : vector<8x8xf32>
    %78 = tpu.matmul %75, %76, %cst_31 {dimension_numbers = #tpu.dot_dimension_numbers<[1], [1], [0], [0], [0, 0, 1, 0], [], []>} : vector<8x8xbf16>, vector<8x8xbf16>, vector<8x8xf32> -> vector<8x8xf32>
    %79 = arith.addf %78, %28 : vector<8x8xf32>
    %cst_32 = arith.constant dense<0xFF800000> : vector<8xf32>
    %80 = vector.multi_reduction <maximumf>, %79, %cst_32 [1] : vector<8x8xf32> to vector<8xf32>
    %81 = vector.shape_cast %80 : vector<8xf32> to vector<8x1xf32>
    %82 = vector.broadcast %81 : vector<8x1xf32> to vector<8x8xf32>
    %83 = arith.subf %79, %82 : vector<8x8xf32>
    %84 = math.exp %83 : vector<8x8xf32>
    %cst_33 = arith.constant dense<0.000000e+00> : vector<8xf32>
    %85 = vector.multi_reduction <add>, %84, %cst_33 [1] : vector<8x8xf32> to vector<8xf32>
    %86 = vector.shape_cast %85 : vector<8xf32> to vector<8x1xf32>
    %87 = arith.truncf %84 : vector<8x8xf32> to vector<8x8xbf16>
    %cst_34 = arith.constant dense<0.000000e+00> : vector<8x8xf32>
    %88 = tpu.matmul %87, %77, %cst_34 {dimension_numbers = #tpu.dot_dimension_numbers<[1], [0], [0], [1], [0, 0, 1, 1], [], []>} : vector<8x8xbf16>, vector<8x8xbf16>, vector<8x8xf32> -> vector<8x8xf32>
    %89 = tpu.reciprocal %86 {approx = true} : vector<8x1xf32> -> vector<8x1xf32>
    %90 = vector.broadcast %89 : vector<8x1xf32> to vector<8x8xf32>
    %91 = arith.mulf %88, %90 : vector<8x8xf32>
    %92 = arith.truncf %91 : vector<8x8xf32> to vector<8x8xbf16>
    %93 = vector.extract_strided_slice %32 {offsets = [16, 0], sizes = [8, 32], strides = [1, 1]} : vector<32x32xbf16> to vector<8x32xbf16>
    %cst_35 = arith.constant dense<0.000000e+00> : vector<8x32xf32>
    %94 = tpu.matmul %92, %93, %cst_35 {dimension_numbers = #tpu.dot_dimension_numbers<[1], [0], [0], [1], [0, 0, 1, 1], [], []>} : vector<8x8xbf16>, vector<8x32xbf16>, vector<8x32xf32> -> vector<8x32xf32>
    %95 = arith.addf %74, %94 : vector<8x32xf32>
    %96 = vector.extract_strided_slice %29 {offsets = [0, 24], sizes = [8, 8], strides = [1, 1]} : vector<8x32xbf16> to vector<8x8xbf16>
    %97 = vector.extract_strided_slice %30 {offsets = [0, 24], sizes = [8, 8], strides = [1, 1]} : vector<8x32xbf16> to vector<8x8xbf16>
    %98 = vector.extract_strided_slice %31 {offsets = [0, 24], sizes = [8, 8], strides = [1, 1]} : vector<8x32xbf16> to vector<8x8xbf16>
    %cst_36 = arith.constant dense<0.000000e+00> : vector<8x8xf32>
    %99 = tpu.matmul %96, %97, %cst_36 {dimension_numbers = #tpu.dot_dimension_numbers<[1], [1], [0], [0], [0, 0, 1, 0], [], []>} : vector<8x8xbf16>, vector<8x8xbf16>, vector<8x8xf32> -> vector<8x8xf32>
    %100 = arith.addf %99, %28 : vector<8x8xf32>
    %cst_37 = arith.constant dense<0xFF800000> : vector<8xf32>
    %101 = vector.multi_reduction <maximumf>, %100, %cst_37 [1] : vector<8x8xf32> to vector<8xf32>
    %102 = vector.shape_cast %101 : vector<8xf32> to vector<8x1xf32>
    %103 = vector.broadcast %102 : vector<8x1xf32> to vector<8x8xf32>
    %104 = arith.subf %100, %103 : vector<8x8xf32>
    %105 = math.exp %104 : vector<8x8xf32>
    %cst_38 = arith.constant dense<0.000000e+00> : vector<8xf32>
    %106 = vector.multi_reduction <add>, %105, %cst_38 [1] : vector<8x8xf32> to vector<8xf32>
    %107 = vector.shape_cast %106 : vector<8xf32> to vector<8x1xf32>
    %108 = arith.truncf %105 : vector<8x8xf32> to vector<8x8xbf16>
    %cst_39 = arith.constant dense<0.000000e+00> : vector<8x8xf32>
    %109 = tpu.matmul %108, %98, %cst_39 {dimension_numbers = #tpu.dot_dimension_numbers<[1], [0], [0], [1], [0, 0, 1, 1], [], []>} : vector<8x8xbf16>, vector<8x8xbf16>, vector<8x8xf32> -> vector<8x8xf32>
    %110 = tpu.reciprocal %107 {approx = true} : vector<8x1xf32> -> vector<8x1xf32>
    %111 = vector.broadcast %110 : vector<8x1xf32> to vector<8x8xf32>
    %112 = arith.mulf %109, %111 : vector<8x8xf32>
    %113 = arith.truncf %112 : vector<8x8xf32> to vector<8x8xbf16>
    %114 = vector.extract_strided_slice %32 {offsets = [24, 0], sizes = [8, 32], strides = [1, 1]} : vector<32x32xbf16> to vector<8x32xbf16>
    %cst_40 = arith.constant dense<0.000000e+00> : vector<8x32xf32>
    %115 = tpu.matmul %113, %114, %cst_40 {dimension_numbers = #tpu.dot_dimension_numbers<[1], [0], [0], [1], [0, 0, 1, 1], [], []>} : vector<8x8xbf16>, vector<8x32xbf16>, vector<8x32xf32> -> vector<8x32xf32>
    %116 = arith.addf %95, %115 : vector<8x32xf32>
    %117 = vector.broadcast %33 : vector<1x32xf32> to vector<8x32xf32>
    %118 = arith.addf %116, %117 : vector<8x32xf32>
    %c0_41 = arith.constant 0 : index
    %c0_42 = arith.constant 0 : index
    %c0_43 = arith.constant 0 : index
    %119 = vector.load %arg9[%c0_41, %c0_42, %c0_43] : memref<1x8x32xf32, #tpu.memory_space<vmem>>, vector<1x8x32xf32>
    %120 = vector.shape_cast %119 : vector<1x8x32xf32> to vector<8x32xf32>
    %121 = vector.shape_cast %118 : vector<8x32xf32> to vector<1x8x32xf32>
    tpu.vector_store %arg9[%c0_41, %c0_42, %c0_43], %121 {strides = array<i32>} : memref<1x8x32xf32, #tpu.memory_space<vmem>>, vector<1x8x32xf32>,
    return
  }
  func.func @transform_0(%arg0: i32) -> (i32, i32, i32) {
    %c0_i32 = arith.constant 0 : i32
    %c0_i32_0 = arith.constant 0 : i32
    %c0_i32_1 = arith.constant 0 : i32
    return %arg0, %c0_i32, %c0_i32_0 : i32, i32, i32
  }
  func.func @transform_1(%arg0: i32) -> (i32, i32, i32) {
    %c0_i32 = arith.constant 0 : i32
    %c0_i32_0 = arith.constant 0 : i32
    %c0_i32_1 = arith.constant 0 : i32
    return %arg0, %c0_i32, %c0_i32_0 : i32, i32, i32
  }
  func.func @transform_2(%arg0: i32) -> (i32, i32, i32) {
    %c0_i32 = arith.constant 0 : i32
    %c0_i32_0 = arith.constant 0 : i32
    %c0_i32_1 = arith.constant 0 : i32
    return %arg0, %c0_i32, %c0_i32_0 : i32, i32, i32
  }
  func.func @transform_3(%arg0: i32) -> (i32, i32) {
    %c0_i32 = arith.constant 0 : i32
    %c0_i32_0 = arith.constant 0 : i32
    %c0_i32_1 = arith.constant 0 : i32
    return %c0_i32, %c0_i32_0 : i32, i32
  }
  func.func @transform_4(%arg0: i32) -> (i32, i32) {
    %c0_i32 = arith.constant 0 : i32
    %c0_i32_0 = arith.constant 0 : i32
    %c0_i32_1 = arith.constant 0 : i32
    return %c0_i32, %c0_i32_0 : i32, i32
  }
  func.func @transform_5(%arg0: i32) -> (i32, i32) {
    %c0_i32 = arith.constant 0 : i32
    %c0_i32_0 = arith.constant 0 : i32
    %c0_i32_1 = arith.constant 0 : i32
    return %c0_i32, %c0_i32_0 : i32, i32
  }
  func.func @transform_6(%arg0: i32) -> (i32, i32) {
    %c0_i32 = arith.constant 0 : i32
    %c0_i32_0 = arith.constant 0 : i32
    %c0_i32_1 = arith.constant 0 : i32
    return %c0_i32, %c0_i32_0 : i32, i32
  }
  func.func @transform_7(%arg0: i32) -> (i32, i32, i32) {
    %c0_i32 = arith.constant 0 : i32
    %c0_i32_0 = arith.constant 0 : i32
    %c0_i32_1 = arith.constant 0 : i32
    %c0_i32_2 = arith.constant 0 : i32
    return %c0_i32, %c0_i32_0, %c0_i32_1 : i32, i32, i32
  }
  func.func @transform_8(%arg0: i32) -> (i32, i32, i32) {
    %c0_i32 = arith.constant 0 : i32
    %c0_i32_0 = arith.constant 0 : i32
    %c0_i32_1 = arith.constant 0 : i32
    return %arg0, %c0_i32, %c0_i32_0 : i32, i32, i32
  }
}

</mosaic_0001>

<bundles_post_ra>
// kernel: tpu_custom_call.1
= control target key start
LH: loop header
LB: loop body
LE: loop exit
PB: predicated region body
PF: predicated region fallthrough
CT: control target
= control target key end

     0   :  { %s2327_s0 = inlined_call_operand.hbm [shape: f32[2,8,32], index: 0, kind: input, shape index: {}]   ;;  %s2328_s1 = inlined_call_operand.hbm [shape: f32[2,8,32], index: 1, kind: input, shape index: {}]   ;;  %s2329_s2 = inlined_call_operand.hbm [shape: f32[2,8,32], index: 2, kind: input, shape index: {}]   ;;  %s2330_s3 = inlined_call_operand.hbm [shape: bf16[32,96], index: 3, kind: input, shape index: {}]   ;;  %s2331_s4 = inlined_call_operand.vmem [shape: f32[1,96], index: 4, kind: input, shape index: {}]   ;;  %s2332_s5 = inlined_call_operand.hbm [shape: bf16[32,32], index: 5, kind: input, shape index: {}]   ;;  %s2333_s6 = inlined_call_operand.vmem [shape: f32[1,32], index: 6, kind: input, shape index: {}]   ;;  %s2334_s7 = inlined_call_operand.vmem [shape: bf16[1,8,8], index: 7, kind: input, shape index: {}]   ;;  %s2335_s8 = inlined_call_operand.hbm [shape: f32[2,8,32], index: 8, kind: output, shape index: {}]  }
   0x1   :  { %2352 = sst [smem:[#allocation21_spill]] %s2327_s0 }
   0x2   :  { %2353 = sst [smem:[#allocation22_spill]] %s2330_s3 }
   0x3   :  { %2354 = sst [smem:[#allocation23_spill]] %s2335_s8 }
   0x4   :  { %13 = vsyncpa [#allocation3], 0 }
   0x5   :  { %15 = vsyncpa [#allocation3 + $0x1], 0 }
   0x6   :  { %16 = vsyncpa [#allocation6], 0 }
   0x7   :  { %18 = vsyncpa [#allocation6 + $0x1], 0 }
   0x8   :  { %19 = vsyncpa [#allocation9], 0 }
   0x9   :  { %20 = vsyncpa [#allocation4], 0 }
   0xa   :  { %22 = vsyncpa [#allocation4 + $0x1], 0  ;;  %s1936_s27 = smov 0   ;;  %s1938_s28 = smov 0  }
   0xb   :  { %s1940_s29 = smov 0   ;;  %s1942_s30 = smov 0  }
   0xc LB: > { %2355 = sst [smem:[#allocation16_spill]] %s1862_s27  ;;  %s1957_s9 = sadd.s32 4294967295, %s1874_s30   ;;  %s1874_s30 = sphi %s1942_s30, %s2385_s30   ;;  %s1870_s29 = sphi %s1940_s29, %s2389_s29   ;;  %s1866_s28 = sphi %s1938_s28, %s2388_s28   ;;  %s1862_s27 = sphi %s1936_s27, %s2387_s27  }
   0xd   : > { %2356 = sst [smem:[#allocation17_spill]] %s1874_s30  ;;  %s1392_s10 = sadd.s32 4294967294, %s1874_s30  }
   0xe   : > { %p48_p0 = scmp.ne.s32.totalorder %s1866_s28, %s1862_s27  ;;  %p2342_p1 = scmp.eq.s32.totalorder %s1957_s9, 0 }
   0xf   : > { %p229_p2 = scmp.eq.s32.totalorder %s1957_s9, 1  ;;  %p235_p3 = scmp.eq.s32.totalorder %s1392_s10, 1 }
  0x10   : > { %p1966_p4 = por %p2342_p1, %p48_p0  ;;  %p1393_p5 = scmp.ge.s32.totalorder %s1874_s30, 1 }
  0x11   : > { %p1971_p6 = por %p235_p3, %p48_p0  ;;  %p242_p7 = scmp.lt.s32.totalorder %s1874_s30, 3 }
  0x12   : > { %s2357_s11 = scalar_select %p1966_p4, 1, 0 }
  0x13   : > { %s2358_s12 = scalar_select %p1971_p6, 1, 0 }
  0x14   : > { %p1976_p8 = pnand %p1393_p5, %p242_p7  ;;  %s1876_s14 = smov [#allocation8]  }
  0x15   : > { %2359 = sst [smem:[#allocation18_spill]] %s2358_s12  ;;  %s254_s15 = sshll.u32 %s1876_s14, 4  ;;  %s255_s15 = int_to_ptr.vmem [resolvable:$true] %s254_s15 }
  0x16   : > { %s2360_s13 = scalar_select %p1976_p8, 1, 0 }
  0x17   : > { %p1578_p9 = pneg %p1976_p8  ;;  %s1990_s17 = sadd.s32 1, %s1874_s30  }
  0x18   : > { %2362 = sst [smem:[#allocation19_spill]] %s1990_s17  ;;  %s35_s18 = sadd.s32 1, %s1870_s29 }
  0x19   : > { %p1985_p11 = pnand %p1578_p9, %p2342_p1  ;;  %s32_s19 = ssub.s32 %s1874_s30, %s1990_s17 }
  0x1a   : > { %s1677_s20 = scalar_lea.vmem %s255_s15, 256  ;;  %p1685_p5 = scmp.lt.s32.totalorder %s255_s15, %s255_s15 }
  0x1b   : > { %s2361_s16 = scalar_select %p1985_p11, 1, 0 }
  0x1c   : > { %p2343_p12 = pneg %p1985_p11  ;;  %p1678_p13 = scmp.ne.s32.totalorder %s255_s15, %s1677_s20 }
  0x1d   : > { %p1686_p7 = scmp.lt.s32.totalorder %s1677_s20, %s1677_s20 }
  0x1e   : > { %p1680_p0 = pnand %p1678_p13, %p2343_p12 }
  0x1f   : > { %p1687_p9 = por %p1686_p7, %p1685_p5 }
  0x20   : > { %p1681_p3 = pneg %p1680_p0 }
  0x22   : > { %p1688_p10 = pnand %p1687_p9, %p1681_p3 }
  0x24   : > { %1691 = shalt.err (!%p1688_p10)
}
  0x25   : > { %s2336_s21 = smov 64   ;;  %s2337_s22 = smov 4  }
  0x26   : > { %s2363_s3 = sld [smem:[#allocation22_spill]]  ;;  %p33_p10 = scmp.eq.s32.totalorder %s32_s19, 0 }
  0x27   : > { %p42_p13 = scmp.ne.s32.totalorder %s1870_s29, %s1866_s28  ;;  %p43_p0 = scmp.eq.s32.totalorder %s1874_s30, 0 }
  0x28   : > { %p1601_p3 = scmp.lt.s32.totalorder %s1874_s30, 2  ;;  %s2338_s10 = sand.u32 1, %s1870_s29  }
  0x29   : > { %s2013_s25 = scalar_select %p33_p10, %s1870_s29, %s35_s18  }
  0x2a   : > { %p44_p5 = por %p43_p0, %p42_p13  ;;  %p2017_p7 = por %p229_p2, %p42_p13 }
  0x2b   : > { %2364 = sst [smem:[#allocation20_spill]] %s2013_s25  ;;  %s2023_s14 = sshll.u32 %s1874_s30, 7 }
  0x2c   : > { %1581 = dma.hbm_to_vmem [thread:$0]  (!%p1985_p11), %s2363_s3, 256, %s255_s15, [#allocation9], %s2336_s21, %s2336_s21, %s2337_s22  }
  0x2d   : > { %s2365_s26 = scalar_select %p2017_p7, 1, 0 }
  0x2e   : > { %s2027_s20 = sshll.u32 %s2338_s10, 3  ;;  %p2029_p9 = pnand %p1601_p3, %p44_p5 }
  0x2f   : > { %s308_s18 = sand.u32 1, %s1874_s30   ;;  %s2038_s24 = scalar_lea.hbm %s2328_s1, %s2023_s14 }
  0x30   : > { %s312_s21 = scalar_lea.vmem [#allocation5], %s2027_s20  ;;  %s2041_s10 = scalar_lea.sflag [#allocation6], %s308_s18 }
  0x31   : > { %s319_s22 = sshll.u32 %s312_s21, 4  ;;  %s1692_s3 = scalar_lea.hbm %s2038_s24, 128  ;;  %s320_s22 = int_to_ptr.vmem [resolvable:$true] %s319_s22 }
  0x32   : > { %p1693_p2 = scmp.ne.s32.totalorder %s2038_s24, %s1692_s3  ;;  %p2047_p10 = pneg %p2029_p9 }
  0x33   : > { %s1697_s17 = scalar_lea.hbm %s2328_s1, 256  ;;  %p1698_p3 = scmp.lt.s32.totalorder %s2038_s24, %s2328_s1 }
  0x34   : > { %p1695_p13 = pnand %p2047_p10, %p1693_p2  ;;  %p1699_p5 = scmp.lt.s32.totalorder %s1697_s17, %s1692_s3 }
  0x36   : > { %p1696_p0 = pneg %p1695_p13  ;;  %p1700_p1 = por %p1699_p5, %p1698_p3 }
  0x38   : > { %p1701_p12 = pnand %p1700_p1, %p1696_p0 }
  0x3a   : > { %1704 = shalt.err (!%p1701_p12)
}
  0x3b   : > { %s1705_s18 = scalar_lea.vmem %s320_s22, 128  ;;  %s1879_s12 = smov [#allocation5]  }
  0x3c   : > { %p1706_p6 = scmp.ne.s32.totalorder %s320_s22, %s1705_s18  ;;  %s1710_s27 = sshll.u32 %s1879_s12, 4  ;;  %s1711_s27 = int_to_ptr.vmem [resolvable:$false] %s1710_s27 }
  0x3d   : > { %s1712_s8 = scalar_lea.vmem %s1711_s27, 256  ;;  %p1713_p2 = scmp.lt.s32.totalorder %s320_s22, %s1711_s27 }
  0x3e   : > { %p1708_p7 = pnand %p1706_p6, %p2047_p10  ;;  %p1714_p13 = scmp.lt.s32.totalorder %s1712_s8, %s1705_s18 }
  0x40   : > { %p1709_p4 = pneg %p1708_p7  ;;  %p1715_p8 = por %p1714_p13, %p1713_p2 }
  0x42   : > { %p1716_p11 = pnand %p1715_p8, %p1709_p4 }
  0x44   : > { %1719 = shalt.err (!%p1716_p11)
}
  0x45   : > { %1591 = dma.hbm_to_vmem [thread:$0]  (!%p2029_p9), %s2038_s24, 128, %s320_s22, %s2041_s10  }
  0x46   : > { %s1880_s3 = smov [#allocation10]   ;;  %p2368_p6 = scmp.ne.s32.totalorder %s2361_s16, 0 }
  0x47   : > { %s270_s30 = sshll.u32 %s1880_s3, 4  ;;  %s271_s30 = int_to_ptr.vmem [resolvable:$true] %s270_s30 }
  0x48   : > { %s1731_s17 = scalar_lea.vmem %s271_s30, 256  ;;  %p2369_p12 = pneg %p2368_p6 }
  0x49   : > { %p1732_p1 = scmp.ne.s32.totalorder %s271_s30, %s1731_s17  ;;  %p1739_p3 = scmp.lt.s32.totalorder %s271_s30, %s271_s30 }
  0x4a   : > { %p1740_p5 = scmp.lt.s32.totalorder %s1731_s17, %s1731_s17 }
  0x4b   : > { %p1734_p7 = pnand %p1732_p1, %p2369_p12 }
  0x4c   : > { %p1741_p2 = por %p1740_p5, %p1739_p3 }
  0x4d   : > { %p1735_p0 = pneg %p1734_p7 }
  0x4f   : > { %p1742_p4 = pnand %p1741_p2, %p1735_p0 }
  0x51   : > { %1745 = shalt.err (!%p1742_p4)
}
  0x52   : > { %s2370_s8 = smov 4   ;;  %s2371_s27 = smov 64  }
  0x53   : > { %1584 = dma.hbm_to_vmem [thread:$0]  (!%p2368_p6), %s2332_s5, 256, %s271_s30, [#allocation9], %s2371_s27, %s2371_s27, %s2370_s8  }
  0x54   : > { %s2372_s0 = sld [smem:[#allocation21_spill]]  ;;  %s294_s16 = scalar_lea.vmem [#allocation2], %s2027_s20 }
  0x55   : > { %s301_s21 = sshll.u32 %s294_s16, 4  ;;  %s2373_s18 = sand.u32 1, %s1870_s29   ;;  %s302_s21 = int_to_ptr.vmem [resolvable:$true] %s301_s21 }
  0x56   : > { %s291_s3 = scalar_lea.sflag [#allocation3], %s2373_s18 }
  0x5a   : > { %s2081_s23 = scalar_lea.hbm %s2372_s0, %s2023_s14  ;;  %s1751_s8 = scalar_lea.hbm %s2372_s0, 256 }
  0x5b   : > { %s1746_s17 = scalar_lea.hbm %s2081_s23, 128  ;;  %p1752_p1 = scmp.lt.s32.totalorder %s2081_s23, %s2372_s0 }
  0x5c   : > { %p1747_p8 = scmp.ne.s32.totalorder %s2081_s23, %s1746_s17  ;;  %p1753_p6 = scmp.lt.s32.totalorder %s1751_s8, %s1746_s17 }
  0x5e   : > { %p1749_p11 = pnand %p1747_p8, %p2047_p10  ;;  %p1754_p12 = por %p1753_p6, %p1752_p1 }
  0x60   : > { %p1750_p13 = pneg %p1749_p11 }
  0x62   : > { %p1755_p7 = pnand %p1754_p12, %p1750_p13 }
  0x64   : > { %1758 = shalt.err (!%p1755_p7)
}
  0x65   : > { %s1759_s24 = scalar_lea.vmem %s302_s21, 128  ;;  %s1881_s19 = smov [#allocation2]  }
  0x66   : > { %p1760_p0 = scmp.ne.s32.totalorder %s302_s21, %s1759_s24  ;;  %s1764_s16 = sshll.u32 %s1881_s19, 4  ;;  %s1765_s16 = int_to_ptr.vmem [resolvable:$false] %s1764_s16 }
  0x67   : > { %s1766_s18 = scalar_lea.vmem %s1765_s16, 256  ;;  %p1767_p2 = scmp.lt.s32.totalorder %s302_s21, %s1765_s16 }
  0x68   : > { %p1762_p3 = pnand %p1760_p0, %p2047_p10  ;;  %p1768_p4 = scmp.lt.s32.totalorder %s1766_s18, %s1759_s24 }
  0x6a   : > { %p1763_p5 = pneg %p1762_p3  ;;  %p1769_p8 = por %p1768_p4, %p1767_p2 }
  0x6c   : > { %p1770_p11 = pnand %p1769_p8, %p1763_p5 }
  0x6e   : > { %1773 = shalt.err (!%p1770_p11)
}
  0x6f   : > { %1588 = dma.hbm_to_vmem [thread:$0]  (!%p2029_p9), %s2081_s23, 128, %s302_s21, %s291_s3  }
  0x70   : > { %s335_s30 = scalar_lea.hbm %s2329_s2, %s2023_s14  ;;  %s330_s8 = scalar_lea.vmem [#allocation7], %s2027_s20 }
  0x71   : > { %s337_s27 = sshll.u32 %s330_s8, 4  ;;  %s1774_s22 = scalar_lea.hbm %s335_s30, 128  ;;  %s338_s27 = int_to_ptr.vmem [resolvable:$true] %s337_s27 }
  0x72   : > { %p1775_p13 = scmp.ne.s32.totalorder %s335_s30, %s1774_s22  ;;  %s1779_s16 = scalar_lea.hbm %s2329_s2, 256 }
  0x73   : > { %p1780_p12 = scmp.lt.s32.totalorder %s335_s30, %s2329_s2  ;;  %p1781_p7 = scmp.lt.s32.totalorder %s1779_s16, %s1774_s22 }
  0x74   : > { %p1777_p1 = pnand %p1775_p13, %p2047_p10 }
  0x75   : > { %p1782_p0 = por %p1781_p7, %p1780_p12 }
  0x76   : > { %p1778_p6 = pneg %p1777_p1 }
  0x78   : > { %p1783_p3 = pnand %p1782_p0, %p1778_p6 }
  0x7a   : > { %1786 = shalt.err (!%p1783_p3)
}
  0x7b   : > { %s1787_s14 = scalar_lea.vmem %s338_s27, 128  ;;  %s1882_s20 = smov [#allocation7]  }
  0x7c   : > { %p1788_p5 = scmp.ne.s32.totalorder %s338_s27, %s1787_s14  ;;  %s1792_s23 = sshll.u32 %s1882_s20, 4  ;;  %s1793_s23 = int_to_ptr.vmem [resolvable:$false] %s1792_s23 }
  0x7d   : > { %s1794_s21 = scalar_lea.vmem %s1793_s23, 256  ;;  %p1795_p8 = scmp.lt.s32.totalorder %s338_s27, %s1793_s23 }
  0x7e   : > { %p1790_p2 = pnand %p1788_p5, %p2047_p10  ;;  %p1796_p11 = scmp.lt.s32.totalorder %s1794_s21, %s1787_s14 }
  0x80   : > { %p1791_p4 = pneg %p1790_p2  ;;  %p1797_p13 = por %p1796_p11, %p1795_p8 }
  0x82   : > { %p1798_p1 = pnand %p1797_p13, %p1791_p4 }
  0x84   : > { %1801 = shalt.err (!%p1798_p1)
}
  0x85   : > { %1594 = dma.hbm_to_vmem [thread:$0]  (!%p2029_p9), %s335_s30, 128, %s338_s27, %s2041_s10  }
  0x86   : > { %p2374_p6 = scmp.ne.s32.totalorder %s2360_s13, 0 }
  0x87   : > { %s2123_s0 = sand.u32 (!%p2374_p6), 1, %s1866_s28   ;;  %p2375_p10 = scmp.ne.s32.totalorder (!%p2374_p6), %s2357_s11, 0 }
  0x88   : > { %346 = sbr.rel (%p2374_p6) target bundleno = 2276 (0x8e4), region = 52  ;;  %s2126_s25 = sshll.u32 (!%p2374_p6), %s2123_s0, 3 }
  0x89   : > { %s349_s3 = scalar_lea.sflag (!%p2374_p6), [#allocation3], %s2123_s0  ;;  %s352_s17 = scalar_lea.vmem (!%p2374_p6), [#allocation2], %s2126_s25 }
  0x8d   : > { %1845 = dma.done.wait (%p2375_p10), %s349_s3, 128  }
  0x8e   : > { %1847 = vsyncadd (%p2375_p10), %s349_s3, 4294967168  ;;  %s357_s13 = sand.u32 1, %s1957_s9   ;;  %s361_s15 = scalar_lea.vmem [#allocation5], %s2126_s25 }
  0x8f   : > { %s358_s10 = scalar_lea.sflag [#allocation6], %s357_s13 }
  0x90   : > { %1849 = dma.done.wait (%p2375_p10), %s358_s10, 256  }
  0x91   : > { %1851 = vsyncadd (%p2375_p10), %s358_s10, 4294967040  ;;  %s370_s12 = scalar_lea.vmem [#allocation7], %s2126_s25  ;;  %p2376_p9 = scmp.eq.s32.totalorder %s1957_s9, 0 }
  0x93   : > { %1853 = dma.done.wait (%p2376_p9), [#allocation9], 512   ;;  %p2377_p12 = pmov %p2376_p9 }
  0x94   : > { %v1883_v0 = vmov 0.0   ;;  %vm1884_vm0 = vmmov 0   ;;  %v1648_v1 = vld [vmem:[#allocation8 + $0x8] sm:$0xff]   ;;  %s1885_s11 = smov 96   ;;  %v1649_v2 = vld [vmem:[#allocation8] sm:$0xff]   ;;  %v427_v3 = vld [vmem:[%s352_s17] sm:$0xff] }
  0x95   : > { %1855 = vsyncadd (%p2377_p12), [#allocation9], 4294966784  ;;  %1474 = vmatprep.subr.bf16.mxu1 %v1883_v0  ;;  %1466 = vmatprep.subr.bf16.mxu0 %v1883_v0  ;;  %v1410_v4 = vld [vmem:[%s2331_s4] ss:$0 sm:$0xff]  ;;  %v428_v5 = vpack.c.bf16 %v427_v3, %v427_v3  ;;  %vm447_vm1 = vcmask 261120   ;;  %v491_v7 = vld [vmem:[%s361_s15] sm:$0xff] }
  0x96   : > { %1478 = vmatprep.mubr.msk.bf16.mxu1 %vm1884_vm0, %v1883_v0  ;;  %1470 = vmatprep.mubr.msk.bf16.mxu0 %vm1884_vm0, %v1883_v0  ;;  %v492_v9 = vpack.c.bf16 %v491_v7, %v491_v7  ;;  %s1886_s27 = smov 120   ;;  %s1887_s22 = smov 64   ;;  %vm609_vm2 = vcmask 64512   ;;  %v545_v28 = vld [vmem:[%s370_s12] sm:$0xff]  ;;  %vm669_vm3 = vcmask 1043456  }
  0x97   : > { %495 = vrot.lane.b32.xlu0 %v1648_v1, %s1885_s11  ;;  %1467 = vmatpush3.bf16.msra.mxu0 %v1648_v1  ;;  %v546_v30 = vpack.c.bf16 %v545_v28, %v545_v28  ;;  %v599_v31 = vld [vmem:[%s2334_s7] sm:$0xf]  ;;  %s1888_s16 = smov 112   ;;  %s1889_s18 = smov 104  }
  0x98   : > { %1468 = vmatprep.subr.bf16.mxu0 %v1883_v0  ;;  %499 = vrot.lane.b32.xlu1 %v1410_v4, %s1885_s11  ;;  %v2194_v32 = vunpack.c.l.bf16 %v599_v31  ;;  %s1430_s23 = sshll.u32 %s1957_s9, 7  ;;  %s420_s21 = scalar_lea.vmem [#allocation11], %s2126_s25 }
  0x99   : > { %s1260_s3 = sshll.u32 %s420_s21, 4  ;;  %s2378_s10 = sld [smem:[#allocation23_spill]]  ;;  %s2285_s3 = int_to_ptr.vmem [resolvable:$true] %s1260_s3 }
  0x9a   : > { %s1247_s9 = scalar_lea.sflag [#allocation4], %s2123_s0  ;;  %s1802_s25 = scalar_lea.vmem %s2285_s3, 128 }
  0x9b   : > { %493 = vrot.lane.b32.xlu0 %v1649_v2, %s1885_s11  ;;  %1469 = vmatpush3.bf16.msra.mxu0 %v1649_v2  ;;  %p1803_p7 = scmp.ne.s32.totalorder %s2285_s3, %s1802_s25  ;;  %p2379_p0 = scmp.ne.s32.totalorder %s2365_s26, 0 }
  0x9c   : > { %1482 = vmatprep.subr.bf16.mxu0 %v1883_v0  ;;  %s1890_s12 = smov [#allocation11]  }
  0x9d   : > { %p1804_p3 = pnand %p1803_p7, %p2379_p0  ;;  %s1806_s11 = sshll.u32 %s1890_s12, 4  ;;  %s1807_s11 = int_to_ptr.vmem [resolvable:$false] %s1806_s11 }
  0x9e   : > { %1471 = vmatmul.mubr.msk.bf16.vlgmr.msra.gmra.mxu0 %vm447_vm1, %v428_v5  ;;  %s1808_s30 = scalar_lea.vmem %s1807_s11, 256  ;;  %p1809_p2 = scmp.lt.s32.totalorder %s2285_s3, %s1807_s11 }
  0x9f   : > { %1486 = vmatprep.mubr.msk.bf16.mxu0 %vm1884_vm0, %v1883_v0  ;;  %s2283_s15 = scalar_lea.hbm %s2378_s10, %s1430_s23  ;;  %p1805_p5 = pneg %p1804_p3 }
  0xa0   : > { %p1810_p4 = scmp.lt.s32.totalorder %s1808_s30, %s1802_s25 }
  0xa2   : > { %p1811_p8 = por %p1810_p4, %p1809_p2 }
  0xa4   : > { %p1812_p11 = pnand %p1811_p8, %p1805_p5 }
 0x109   : > { %v496_v6 = vpop.permute.xlu0 %495 }
 0x10a   : > { %1475 = vmatpush3.bf16.msra.mxu1 %v496_v6  ;;  %v500_v16 = vpop.permute.xlu1 %499  ;;  %v605_v6 = vld [vmem:[#allocation10 + $0x4] sm:$0xf] }
 0x10b   : > { %1476 = vmatprep.subr.bf16.mxu1 %v1883_v0  ;;  %v834_v7 = vsel %vm669_vm3, %v605_v6, 0 }
 0x10d   : > { %v494_v8 = vpop.permute.xlu0 %493 }
 0x10e   : > { %1477 = vmatpush3.bf16.msra.mxu1 %v494_v8 }
 0x10f   : > { %1490 = vmatprep.subr.bf16.mxu1 %v1883_v0 }
 0x111   : > { %1479 = vmatmul.mubr.msk.bf16.vlgmr.msra.gmra.mxu1 %vm447_vm1, %v492_v9 }
 0x112   : > { %1492 = vmatprep.mubr.msk.bf16.mxu1 %vm1884_vm0, %v1883_v0 }
 0x15e   : > { %v485_v10 = vpop.f32.mrf.mxu0 }
 0x15f   : > { %v486_v11 = vadd.f32 %v1410_v4, %v485_v10 }
 0x160   : > { %v1472_v12 = vpop.f32.mrf.mxu0 }
 0x161   : > { %v2164_v13 = vpack.c.bf16 %v486_v11, %v486_v11 }
 0x162   : > { %v488_v14 = vpop.f32.mrf.mxu0 }
 0x163   : > { %717 = vrot.lane.b32.xlu0 %v2164_v13, %s1886_s27 }
 0x164   : > { %v1473_v15 = vpop.f32.mrf.mxu0 }
 0x167   : > { %547 = vrot.lane.b32.xlu0 %v1649_v2, %s1887_s22 }
 0x1d1   : > { %v539_v17 = vpop.f32.mrf.mxu1 }
 0x1d2   : > { %v540_v18 = vadd.f32 %v539_v17, %v500_v16 }
 0x1d3   : > { %v1480_v19 = vpop.f32.mrf.mxu1 }
 0x1d4   : > { %v2168_v20 = vpack.c.bf16 %v540_v18, %v540_v18 }
 0x1d5   : > { %v542_v21 = vpop.f32.mrf.mxu1  ;;  %v718_v25 = vpop.permute.xlu0 %717 }
 0x1d6   : > { %720 = vrot.lane.b32.xlu1 %v2168_v20, %s1886_s27  ;;  %v614_v22 = vsel %vm609_vm2, %v2168_v20, 0 }
 0x1d7   : > { %v1481_v23 = vpop.f32.mrf.mxu1  ;;  %1491 = vmatpush3.bf16.xpose.msra.mxu1 %v614_v22 }
 0x1d8   : > { %1502 = vmatprep.subr.bf16.mxu1 %v1883_v0 }
 0x1d9   : > { %v548_v29 = vpop.permute.xlu0 %547 }
 0x1da   : > { %549 = vrot.lane.b32.xlu1 %v1648_v1, %s1887_s22  ;;  %v604_v1 = vld [vmem:[#allocation10] sm:$0xf] }
 0x1db   : > { %v880_v5 = vsel %vm669_vm3, %v604_v1, 0 }
 0x1de   : > { %1493 = vmatmul.mubr.msk.bf16.vlgmr.msra.gmra.mxu1 %vm609_vm2, %v2164_v13  ;;  %553 = vrot.lane.b32.xlu1 %v1410_v4, %s1887_s22 }
 0x1df   : > { %1504 = vmatprep.mubr.msk.bf16.mxu1 %vm1884_vm0, %v1883_v0 }
 0x248   : > { %v721_v24 = vpop.permute.xlu1 %720 }
 0x249   : > { %v726_v26 = vsel %vm609_vm2, %v721_v24, 0 }
 0x24a   : > { %1503 = vmatpush3.bf16.xpose.msra.mxu1 %v726_v26 }
 0x24b   : > { %1514 = vmatprep.subr.bf16.mxu1 %v1883_v0 }
 0x24c   : > { %v550_v27 = vpop.permute.xlu1 %549 }
 0x24d   : > { %1483 = vmatpush3.bf16.msra.mxu0 %v550_v27 }
 0x24e   : > { %1484 = vmatprep.subr.bf16.mxu0 %v1883_v0 }
 0x250   : > { %v554_v41 = vpop.permute.xlu1 %553 }
 0x251   : > { %1485 = vmatpush3.bf16.msra.mxu0 %v548_v29  ;;  %1505 = vmatmul.mubr.msk.bf16.vlgmr.msra.gmra.mxu1 %vm609_vm2, %v718_v25 }
 0x252   : > { %1496 = vmatprep.subr.bf16.mxu0 %v1883_v0  ;;  %1516 = vmatprep.mubr.msk.bf16.mxu1 %vm1884_vm0, %v1883_v0 }
 0x253   : > { %1515 = vmatpush3.bf16.msra.mxu1 %v834_v7 }
 0x254   : > { %1487 = vmatmul.mubr.msk.bf16.vlgmr.msra.gmra.mxu0 %vm447_vm1, %v546_v30  ;;  %1526 = vmatprep.subr.bf16.mxu1 %v1883_v0 }
 0x255   : > { %1498 = vmatprep.mubr.msk.bf16.mxu0 %vm1884_vm0, %v1883_v0 }
 0x29e   : > { %v650_v33 = vpop.f32.mrf.mxu1 }
 0x29f   : > { %v651_v34 = vadd.f32 %v650_v33, %v2194_v32 }
 0x2a0   : > { %v1494_v35 = vpop.f32.mrf.mxu1 }
 0x2a1   : > { %v656_v36 = vsel %vm609_vm2, %v651_v34, -inf }
 0x2a2   : > { %657 = vmax.xlane.f32.xlu0 %v656_v36  ;;  %v653_v37 = vpop.f32.mrf.mxu1 }
 0x2a4   : > { %v1495_v38 = vpop.f32.mrf.mxu1 }
 0x311   : > { %v762_v39 = vpop.f32.mrf.mxu1 }
 0x312   : > { %v763_v40 = vadd.f32 %v762_v39, %v2194_v32 }
 0x313   : > { %v1506_v42 = vpop.f32.mrf.mxu1 }
 0x314   : > { %v593_v43 = vpop.f32.mrf.mxu0  ;;  %v768_v44 = vsel %vm609_vm2, %v763_v40, -inf }
 0x315   : > { %v594_v45 = vadd.f32 %v593_v43, %v554_v41  ;;  %769 = vmax.xlane.f32.xlu1 %v768_v44  ;;  %v765_v46 = vpop.f32.mrf.mxu1 }
 0x316   : > { %v1488_v47 = vpop.f32.mrf.mxu0 }
 0x317   : > { %v2200_v48 = vpack.c.bf16 %v594_v45, %v594_v45  ;;  %v1507_v49 = vpop.f32.mrf.mxu1 }
 0x318   : > { %v596_v50 = vpop.f32.mrf.mxu0 }
 0x319   : > { %779 = vrot.lane.b32.xlu0 %v2200_v48, %s1886_s27  ;;  %v671_v51 = vsel %vm669_vm3, %v2200_v48, 0 }
 0x31a   : > { %v1489_v52 = vpop.f32.mrf.mxu0  ;;  %1497 = vmatpush3.bf16.msra.mxu0 %v671_v51 }
 0x31b   : > { %1508 = vmatprep.subr.bf16.mxu0 %v1883_v0 }
 0x31d   : > { %922 = vrot.lane.b32.xlu0 %v2164_v13, %s1888_s16 }
 0x32b   : > { %v658_v53 = vpop.xlane.xlu0 %657 }
 0x32c   : > { %v659_v54 = vsub.f32 %v651_v34, %v658_v53 }
 0x32e   : > { %v660_v55 = vmul.f32 1.442695, %v659_v54  ;;  %v606_v54 = vld [vmem:[#allocation10 + $0x8] sm:$0xf] }
 0x330   : > { %1650 = vpow2.f32 %v660_v55  ;;  %v1037_v55 = vsel %vm669_vm3, %v606_v54, 0 }
 0x33d   : > { %v1651_v56 = vpop.eup %1650 }
 0x33e   : > { %v662_v57 = vsel %vm609_vm2, %v1651_v56, 0.0  ;;  %v665_v58 = vpack.c.bf16 %v1651_v56, %v1651_v56 }
 0x33f   : > { %663 = vadd.xlane.f32.xlu0 %v662_v57 }
 0x340   : > { %1499 = vmatmul.mubr.msk.bf16.vlgmr.msra.gmra.mxu0 %vm609_vm2, %v665_v58 }
 0x341   : > { %1510 = vmatprep.mubr.msk.bf16.mxu0 %vm1884_vm0, %v1883_v0 }
 0x355   : > { %982 = vrot.lane.b32.xlu0 %v2200_v48, %s1888_s16 }
 0x359   : > { %1080 = vrot.lane.b32.xlu0 %v2164_v13, %s1889_s18 }
 0x38b   : > { %v780_v59 = vpop.permute.xlu0 %779 }
 0x38c   : > { %v785_v60 = vsel %vm669_vm3, %v780_v59, 0 }
 0x38d   : > { %1509 = vmatpush3.bf16.msra.mxu0 %v785_v60 }
 0x38e   : > { %1520 = vmatprep.subr.bf16.mxu0 %v1883_v0 }
 0x38f   : > { %v923_v8 = vpop.permute.xlu0 %922 }
 0x39e   : > { %v770_v61 = vpop.xlane.xlu1 %769 }
 0x39f   : > { %v771_v62 = vsub.f32 %v763_v40, %v770_v61 }
 0x3a1   : > { %v772_v63 = vmul.f32 1.442695, %v771_v62 }
 0x3a3   : > { %1652 = vpow2.f32 %v772_v63 }
 0x3b0   : > { %v1653_v2 = vpop.eup %1652 }
 0x3b1   : > { %v774_v3 = vsel %vm609_vm2, %v1653_v2, 0.0  ;;  %v777_v4 = vpack.c.bf16 %v1653_v2, %v1653_v2 }
 0x3b2   : > { %775 = vadd.xlane.f32.xlu1 %v774_v3 }
 0x3b3   : > { %1511 = vmatmul.mubr.msk.bf16.vlgmr.msra.gmra.mxu0 %vm609_vm2, %v777_v4 }
 0x3b4   : > { %1521 = vmatpush3.bf16.msra.mxu0 %v880_v5  ;;  %1522 = vmatprep.mubr.msk.bf16.mxu0 %vm1884_vm0, %v1883_v0 }
 0x3b5   : > { %1532 = vmatprep.subr.bf16.mxu0 %v1883_v0 }
 0x3c3   : > { %924 = vrot.lane.b32.xlu1 %v2168_v20, %s1888_s16 }
 0x3c8   : > { %v664_v9 = vpop.xlane.xlu0 %663 }
 0x3c9   : > { %1654 = vrcp.f32 %v664_v9 }
 0x3cc   : > { %v983_v13 = vpop.permute.xlu0 %982 }
 0x3cd   : > { %v988_v17 = vsel %vm669_vm3, %v983_v13, 0  ;;  %v607_v13 = vld [vmem:[#allocation10 + $0xc] sm:$0xf] }
 0x3d6   : > { %v1655_v10 = vpop.eup %1654 }
 0x400   : > { %v707_v11 = vpop.f32.mrf.mxu0 }
 0x401   : > { %v714_v12 = vmul.f32 %v1655_v10, %v707_v11 }
 0x402   : > { %v1500_v14 = vpop.f32.mrf.mxu0 }
 0x403   : > { %v715_v15 = vpack.c.bf16 %v714_v12, %v714_v12  ;;  %v1195_v14 = vsel %vm669_vm3, %v607_v13, 0 }
 0x404   : > { %v710_v16 = vpop.f32.mrf.mxu0 }
 0x405   : > { %1523 = vmatmul.mubr.msk.bf16.vlgmr.msra.gmra.mxu0 %vm609_vm2, %v715_v15 }
 0x406   : > { %1533 = vmatpush3.bf16.msra.mxu0 %v988_v17  ;;  %v1501_v18 = vpop.f32.mrf.mxu0  ;;  %1534 = vmatprep.mubr.msk.bf16.mxu0 %vm1884_vm0, %v1883_v0 }
 0x407   : > { %1544 = vmatprep.subr.bf16.mxu0 %v1883_v0 }
 0x43b   : > { %v776_v19 = vpop.xlane.xlu1 %775 }
 0x43c   : > { %1656 = vrcp.f32 %v776_v19 }
 0x43f   : > { %v925_v24 = vpop.permute.xlu1 %924 }
 0x440   : > { %v930_v28 = vsel %vm609_vm2, %v925_v24, 0 }
 0x449   : > { %v1657_v21 = vpop.eup %1656 }
 0x473   : > { %v821_v22 = vpop.f32.mrf.mxu0 }
 0x474   : > { %v828_v23 = vmul.f32 %v1657_v21, %v821_v22 }
 0x475   : > { %v1512_v25 = vpop.f32.mrf.mxu0 }
 0x476   : > { %v829_v26 = vpack.c.bf16 %v828_v23, %v828_v23 }
 0x477   : > { %v824_v27 = vpop.f32.mrf.mxu0 }
 0x478   : > { %1517 = vmatmul.mubr.msk.bf16.vlgmr.msra.gmra.mxu1 %vm609_vm2, %v829_v26 }
 0x479   : > { %1527 = vmatpush3.bf16.xpose.msra.mxu1 %v930_v28  ;;  %v1513_v29 = vpop.f32.mrf.mxu0  ;;  %1528 = vmatprep.mubr.msk.bf16.mxu1 %vm1884_vm0, %v1883_v0 }
 0x47a   : > { %1538 = vmatprep.subr.bf16.mxu1 %v1883_v0  ;;  %v1428_v29 = vld [vmem:[%s2333_s6] ss:$0 sm:$0xff] }
 0x480   : > { %1529 = vmatmul.mubr.msk.bf16.vlgmr.msra.gmra.mxu1 %vm609_vm2, %v923_v8 }
 0x481   : > { %1540 = vmatprep.mubr.msk.bf16.mxu1 %vm1884_vm0, %v1883_v0  ;;  %1539 = vmatpush3.bf16.msra.mxu1 %v1037_v55 }
 0x482   : > { %1550 = vmatprep.subr.bf16.mxu1 %v1883_v0 }
 0x4c5   : > { %v2242_v30 = vpop.f32.mrf.mxu0 }
 0x4c7   : > { %v1524_v31 = vpop.f32.mrf.mxu0 }
 0x4c9   : > { %v919_v33 = vpop.f32.mrf.mxu0 }
 0x4cb   : > { %v1525_v34 = vpop.f32.mrf.mxu0 }
 0x538   : > { %v2244_v35 = vpop.f32.mrf.mxu1 }
 0x53a   : > { %v1518_v36 = vpop.f32.mrf.mxu1 }
 0x53c   : > { %v873_v37 = vpop.f32.mrf.mxu1 }
 0x53e   : > { %v1519_v38 = vpop.f32.mrf.mxu1 }
 0x540   : > { %v966_v39 = vpop.f32.mrf.mxu1 }
 0x541   : > { %v967_v40 = vadd.f32 %v966_v39, %v2194_v32 }
 0x542   : > { %v1530_v41 = vpop.f32.mrf.mxu1 }
 0x543   : > { %v972_v42 = vsel %vm609_vm2, %v967_v40, -inf }
 0x544   : > { %973 = vmax.xlane.f32.xlu1 %v972_v42  ;;  %v969_v43 = vpop.f32.mrf.mxu1 }
 0x546   : > { %v1531_v44 = vpop.f32.mrf.mxu1 }
 0x555   : > { %1082 = vrot.lane.b32.xlu1 %v2168_v20, %s1889_s18  ;;  %v1081_v20 = vpop.permute.xlu0 %1080 }
 0x5cd   : > { %v974_v45 = vpop.xlane.xlu1 %973 }
 0x5ce   : > { %v975_v46 = vsub.f32 %v967_v40, %v974_v45 }
 0x5d0   : > { %v976_v47 = vmul.f32 1.442695, %v975_v46 }
 0x5d1   : > { %v1083_v50 = vpop.permute.xlu1 %1082 }
 0x5d2   : > { %1658 = vpow2.f32 %v976_v47  ;;  %v1088_v53 = vsel %vm609_vm2, %v1083_v50, 0 }
 0x5df   : > { %v1659_v49 = vpop.eup %1658 }
 0x5e0   : > { %v978_v51 = vsel %vm609_vm2, %v1659_v49, 0.0  ;;  %v981_v52 = vpack.c.bf16 %v1659_v49, %v1659_v49 }
 0x5e1   : > { %979 = vadd.xlane.f32.xlu1 %v978_v51 }
 0x5e2   : > { %1535 = vmatmul.mubr.msk.bf16.vlgmr.msra.gmra.mxu0 %vm609_vm2, %v981_v52 }
 0x5e3   : > { %1545 = vmatpush3.bf16.xpose.msra.mxu0 %v1088_v53  ;;  %1546 = vmatprep.mubr.msk.bf16.mxu0 %vm1884_vm0, %v1883_v0 }
 0x5e4   : > { %1556 = vmatprep.subr.bf16.mxu0 %v1883_v0 }
 0x5ea   : > { %1547 = vmatmul.mubr.msk.bf16.vlgmr.msra.gmra.mxu0 %vm609_vm2, %v1081_v20 }
 0x5eb   : > { %1558 = vmatprep.mubr.msk.bf16.mxu0 %vm1884_vm0, %v1883_v0  ;;  %1557 = vmatpush3.bf16.msra.mxu0 %v1195_v14 }
 0x66a   : > { %v980_v56 = vpop.xlane.xlu1 %979 }
 0x66b   : > { %1660 = vrcp.f32 %v980_v56 }
 0x678   : > { %v1661_v57 = vpop.eup %1660 }
 0x6a2   : > { %v1024_v58 = vpop.f32.mrf.mxu0 }
 0x6a3   : > { %v1031_v59 = vmul.f32 %v1661_v57, %v1024_v58 }
 0x6a4   : > { %v1536_v60 = vpop.f32.mrf.mxu0 }
 0x6a5   : > { %v1032_v61 = vpack.c.bf16 %v1031_v59, %v1031_v59 }
 0x6a6   : > { %v1027_v62 = vpop.f32.mrf.mxu0 }
 0x6a7   : > { %1541 = vmatmul.mubr.msk.bf16.vlgmr.msra.gmra.mxu1 %vm609_vm2, %v1032_v61 }
 0x6a8   : > { %v1537_v63 = vpop.f32.mrf.mxu0  ;;  %1552 = vmatprep.mubr.msk.bf16.mxu1 %vm1884_vm0, %v1883_v0 }
 0x6aa   : > { %v1124_v1 = vpop.f32.mrf.mxu0 }
 0x6ab   : > { %v1125_v2 = vadd.f32 %v1124_v1, %v2194_v32 }
 0x6ac   : > { %v1548_v3 = vpop.f32.mrf.mxu0 }
 0x6ad   : > { %v1130_v4 = vsel %vm609_vm2, %v1125_v2, -inf }
 0x6ae   : > { %1131 = vmax.xlane.f32.xlu0 %v1130_v4  ;;  %v1127_v5 = vpop.f32.mrf.mxu0 }
 0x6b0   : > { %v1549_v6 = vpop.f32.mrf.mxu0 }
 0x6c4   : > { %1140 = vrot.lane.b32.xlu0 %v2200_v48, %s1889_s18  ;;  %v917_v48 = vadd.f32 %v2242_v30, %v2244_v35 }
 0x737   : > { %v1132_v7 = vpop.xlane.xlu0 %1131 }
 0x738   : > { %v1133_v8 = vsub.f32 %v1125_v2, %v1132_v7 }
 0x73a   : > { %v1134_v9 = vmul.f32 1.442695, %v1133_v8 }
 0x73b   : > { %v1141_v10 = vpop.permute.xlu0 %1140 }
 0x73c   : > { %1662 = vpow2.f32 %v1134_v9  ;;  %v1146_v11 = vsel %vm669_vm3, %v1141_v10, 0 }
 0x73d   : > { %1551 = vmatpush3.bf16.msra.mxu1 %v1146_v11 }
 0x749   : > { %v1663_v0 = vpop.eup %1662 }
 0x74a   : > { %v1136_v32 = vsel %vm609_vm2, %v1663_v0, 0.0  ;;  %v1139_v12 = vpack.c.bf16 %v1663_v0, %v1663_v0 }
 0x74b   : > { %1137 = vadd.xlane.f32.xlu1 %v1136_v32 }
 0x74c   : > { %1553 = vmatmul.mubr.msk.bf16.vlgmr.msra.gmra.mxu1 %vm609_vm2, %v1139_v12 }
 0x767   : > { %v1073_v15 = vpop.f32.mrf.mxu1 }
 0x768   : > { %v1079_v16 = vadd.f32 %v1073_v15, %v917_v48 }
 0x769   : > { %v1542_v17 = vpop.f32.mrf.mxu1 }
 0x76b   : > { %v1076_v18 = vpop.f32.mrf.mxu1 }
 0x76d   : > { %v1543_v19 = vpop.f32.mrf.mxu1 }
 0x7d4   : > { %v1138_v21 = vpop.xlane.xlu1 %1137 }
 0x7d5   : > { %1664 = vrcp.f32 %v1138_v21 }
 0x7e2   : > { %v1665_v22 = vpop.eup %1664 }
 0x80c   : > { %v1182_v23 = vpop.f32.mrf.mxu1 }
 0x80d   : > { %v1189_v24 = vmul.f32 %v1665_v22, %v1182_v23 }
 0x80e   : > { %v1554_v25 = vpop.f32.mrf.mxu1 }
 0x80f   : > { %v1190_v26 = vpack.c.bf16 %v1189_v24, %v1189_v24 }
 0x810   : > { %v1185_v27 = vpop.f32.mrf.mxu1 }
 0x811   : > { %1559 = vmatmul.mubr.msk.bf16.vlgmr.msra.gmra.mxu0 %vm609_vm2, %v1190_v26 }
 0x812   : > { %v1555_v28 = vpop.f32.mrf.mxu1 }
 0x8d1   : > { %v1231_v30 = vpop.f32.mrf.mxu0 }
 0x8d2   : > { %v1237_v31 = vadd.f32 %v1231_v30, %v1079_v16 }
 0x8d3   : > { %v1560_v33 = vpop.f32.mrf.mxu0 }
 0x8d4   : > { %v1244_v34 = vadd.f32 %v1428_v29, %v1237_v31 }
 0x8d5   : > { %v1234_v35 = vpop.f32.mrf.mxu0 }
 0x8d6   : > { %1245 = vst.msk [vmem:[%s420_s21] sm:$0xff] %vm447_vm1, %v1244_v34 }
 0x8d7   : > { %v1561_v36 = vpop.f32.mrf.mxu0 }
 0x8d8   : > { %1815 = shalt.err (!%p1812_p11)
}
 0x8d9   : > { %s1816_s8 = scalar_lea.hbm %s2283_s15, 128  ;;  %s1820_s22 = scalar_lea.hbm %s2378_s10, 256 }
 0x8da   : > { %p1817_p13 = scmp.ne.s32.totalorder %s2283_s15, %s1816_s8  ;;  %p1821_p10 = scmp.lt.s32.totalorder %s2283_s15, %s2378_s10 }
 0x8db   : > { %p1822_p9 = scmp.lt.s32.totalorder %s1820_s22, %s1816_s8 }
 0x8dc   : > { %p1818_p1 = pnand %p1817_p13, %p2379_p0 }
 0x8dd   : > { %p1823_p12 = por %p1822_p9, %p1821_p10 }
 0x8de   : > { %p1819_p6 = pneg %p1818_p1 }
 0x8e0   : > { %p1824_p7 = pnand %p1823_p12, %p1819_p6 }
 0x8e2   : > { %1827 = shalt.err (!%p1824_p7)
}
 0x8e3   : > { %1576 = dma.vmem_to_hbm [thread:$0]  (%p2379_p0), %s2285_s3, 128, %s2283_s15, %s1247_s9  }
 0x8e4 PF: > { %s2380_s16 = sld [smem:[#allocation16_spill]] }
 0x8e5   : > { %s2381_s18 = sld [smem:[#allocation18_spill]] }
 0x8e6   : > { %s2382_s14 = sld [smem:[#allocation17_spill]] }
 0x8ea   : > { %s1272_s20 = sand.u32 1, %s2380_s16  }
 0x8eb   : > { %p2383_p3 = scmp.ne.s32.totalorder %s2381_s18, 0  ;;  %s1273_s23 = scalar_lea.sflag [#allocation4], %s1272_s20 }
 0x8ec   : > { %p2384_p5 = scmp.ge.s32.totalorder %s2382_s14, 2 }
 0x8ee   : > { %p1596_p2 = pnand %p2384_p5, %p2383_p3 }
 0x8f0   : > { %p1597_p4 = pneg %p1596_p2 }
 0x8f2   : > { %1857 = dma.done.wait (%p1597_p4), %s1273_s23, 128  }
 0x8f3   : > { %1859 = vsyncadd (%p1597_p4), %s1273_s23, 4294967168  ;;  %s2385_s30 = sld [smem:[#allocation19_spill]]  ;;  %s2387_s27 = smov %s1866_s28 }
 0x8f4   : > { %s2386_s21 = sld [smem:[#allocation20_spill]]  ;;  %s2388_s28 = smov %s1870_s29 }
 0x8f9   : > { %p25_p8 = scmp.ge.s32.totalorder %s2385_s30, 4  }
 0x8fa   : > { %s2389_s29 = smov %s2386_s21 }
 0x8fb   :  { %27 = sbr.rel (!%p25_p8) target bundleno = 12 (0xc), region = 129 }
 0x900   :  { %1278 = vsyncpa [#allocation3], 1 }
 0x901   :  { %1280 = vsyncpa [#allocation3 + $0x1], 1 }
 0x902   :  { %1281 = vsyncpa [#allocation6], 1 }
 0x903   :  { %1283 = vsyncpa [#allocation6 + $0x1], 1 }
 0x904   :  { %1284 = vsyncpa [#allocation9], 1 }
 0x905   :  { %1285 = vsyncpa [#allocation4], 1 }
 0x906   :  { %1287 = vsyncpa [#allocation4 + $0x1], 1 }

</bundles_post_ra>
